<compile_context>
chip_gen: v7x
topology: tpu7x:2x2x1
jax: 0.10.0
libtpu: 0.0.40
codegen_flags: <defaults>
</compile_context>

<pallas_src>
import functools

import jax
import jax.numpy as jnp
from jax.experimental import pallas as pl
from jax.experimental.pallas import tpu as pltpu

_VMEM_BLOCK_BUDGET = 24 * 1024 * 1024  # bytes for the 4 double-buffered blocks


def _shuffle_kernel(x_ref, o_ref, *, groups):
    # x_ref / o_ref: (BN, C, TS) VMEM tiles.
    bn, C, ts = x_ref.shape
    cpg = C // groups

    if groups == 1 or cpg == 1:
        # Shuffle is the identity: plain copy.
        o_ref[...] = x_ref[...]
        return

    # Unrolled over the (small, static) batch sub-block; each iteration is a
    # proven 3-D sublane permute: (C, TS) -> (g, cpg, TS) -> (cpg, g, TS) -> (C, TS).
    for b in range(bn):
        blk = x_ref[b].reshape(groups, cpg, ts)
        o_ref[b] = jnp.transpose(blk, (1, 0, 2)).reshape(C, ts)


def _choose_spatial_tile(S, C, itemsize, budget_bytes=_VMEM_BLOCK_BUDGET):
    """Largest 128-multiple tile of S keeping 4 double-buffered (C, TS) blocks
    under `budget_bytes`, preferring tiles that divide S evenly."""
    if S % 128 != 0:
        # Block last dim must be a multiple of 128 or the full extent.
        return S
    max_ts = budget_bytes // (4 * C * itemsize)
    max_ts = max(128, (max_ts // 128) * 128)
    ts = min(S, max_ts)
    ts = max(128, (ts // 128) * 128)
    while ts > 128 and S % ts != 0:
        ts -= 128
    if S % ts != 0:
        ts = S
    return ts


def _choose_batch_block(N, C, S, itemsize, budget_bytes=_VMEM_BLOCK_BUDGET):
    """When S fits in one tile, pack several batch elements per block.
    Keeps >= 2 grid steps (pipelining) and 4 blocks under the VMEM budget."""
    if N <= 1:
        return 1
    per_batch = C * S * itemsize
    max_bn = max(1, budget_bytes // (4 * per_batch))
    max_bn = min(max_bn, N // 2)  # keep at least 2 grid steps for overlap
    bn = 1
    for cand in range(max_bn, 0, -1):
        if N % cand == 0:
            bn = cand
            break
    return bn


def channel_shuffle_pallas(x, groups):
    """x: (N, C, D, H, W) -> channel-shuffled (N, C, D, H, W)."""
    N, C, D, H, W = x.shape
    assert C % groups == 0, "num_channels must be divisible by groups"
    S = D * H * W
    x_flat = x.reshape(N, C, S)

    itemsize = jnp.dtype(x.dtype).itemsize
    ts = _choose_spatial_tile(S, C, itemsize)
    num_s_tiles = S // ts

    bn = _choose_batch_block(N, C, S, itemsize) if num_s_tiles == 1 else 1
    num_n_tiles = N // bn

    block_bytes = bn * C * ts * itemsize
    # 2 input + 2 output double-buffered blocks, with 2x headroom; stay below
    # v7x's 64 MiB physical VMEM per TensorCore.
    vmem_limit = int(min(max(8 * block_bytes, 32 << 20), 60 << 20))

    kernel = functools.partial(_shuffle_kernel, groups=groups)
    out_flat = pl.pallas_call(
        kernel,
        out_shape=jax.ShapeDtypeStruct((N, C, S), x.dtype),
        grid_spec=pltpu.PrefetchScalarGridSpec(
            num_scalar_prefetch=0,
            grid=(num_n_tiles, num_s_tiles),
            in_specs=[pl.BlockSpec((bn, C, ts), lambda n, s: (n, 0, s))],
            out_specs=pl.BlockSpec((bn, C, ts), lambda n, s: (n, 0, s)),
        ),
        compiler_params=pltpu.CompilerParams(
            dimension_semantics=("parallel", "parallel"),
            vmem_limit_bytes=vmem_limit,
        ),
    )(x_flat)
    return out_flat.reshape(N, C, D, H, W)


def channel_shuffle_ref(x, groups):
    N, C, D, H, W = x.shape
    cpg = C // groups
    y = x.reshape(N, groups, cpg, D, H, W)
    y = jnp.transpose(y, (0, 2, 1, 3, 4, 5))
    return y.reshape(N, C, D, H, W)


if __name__ == "__main__":
    key = jax.random.PRNGKey(0)
    N, C, D, H, W = 2, 8, 4, 8, 8   # S = D*H*W = 256 (multiple of 128)
    groups = 2
    x = jax.random.normal(key, (N, C, D, H, W), dtype=jnp.float32)

    out = channel_shuffle_pallas(x, groups)
    out = jax.block_until_ready(out)

    ref = channel_shuffle_ref(x, groups)
    assert out.shape == ref.shape
    assert jnp.array_equal(out, ref), "mismatch vs reference channel shuffle"

    print("KERNEL_OK")
</pallas_src>

<mosaic_0001>
module attributes {stable_mosaic.version = 11 : i64} {
  func.func @_shuffle_kernel(%arg0: i32, %arg1: i32, %arg2: memref<1x8x256xf32, #tpu.memory_space<vmem>>, %arg3: memref<1x8x256xf32, #tpu.memory_space<vmem>>) attributes {dimension_semantics = [#tpu.dimension_semantics<parallel>, #tpu.dimension_semantics<parallel>], iteration_bounds = array<i64: 2, 1>, scalar_prefetch = 0 : i64, scratch_operands = 0 : i64, tpu.core_type = #tpu.core_type<tc>, window_params = [{transform_indices = @transform_0, window_bounds = array<i64: 1, 8, 256>}, {transform_indices = @transform_1, window_bounds = array<i64: 1, 8, 256>}]} {
    %c0 = arith.constant 0 : index
    %c0_0 = arith.constant 0 : index
    %c0_1 = arith.constant 0 : index
    %0 = vector.load %arg2[%c0, %c0_0, %c0_1] : memref<1x8x256xf32, #tpu.memory_space<vmem>>, vector<1x8x256xf32>
    %1 = vector.shape_cast %0 : vector<1x8x256xf32> to vector<8x256xf32>
    %2 = vector.shape_cast %1 : vector<8x256xf32> to vector<2x4x256xf32>
    %3 = tpu.transpose %2, [1, 0, 2] : vector<2x4x256xf32> -> vector<4x2x256xf32>
    %4 = vector.shape_cast %3 : vector<4x2x256xf32> to vector<8x256xf32>
    %c0_2 = arith.constant 0 : index
    %c0_3 = arith.constant 0 : index
    %c0_4 = arith.constant 0 : index
    %5 = vector.load %arg3[%c0_2, %c0_3, %c0_4] : memref<1x8x256xf32, #tpu.memory_space<vmem>>, vector<1x8x256xf32>
    %6 = vector.shape_cast %5 : vector<1x8x256xf32> to vector<8x256xf32>
    %7 = vector.shape_cast %4 : vector<8x256xf32> to vector<1x8x256xf32>
    tpu.vector_store %arg3[%c0_2, %c0_3, %c0_4], %7 {strides = array<i32>} : memref<1x8x256xf32, #tpu.memory_space<vmem>>, vector<1x8x256xf32>,
    return
  }
  func.func @transform_0(%arg0: i32, %arg1: i32) -> (i32, i32, i32) {
    %c0_i32 = arith.constant 0 : i32
    %c0_i32_0 = arith.constant 0 : i32
    return %arg0, %c0_i32, %arg1 : i32, i32, i32
  }
  func.func @transform_1(%arg0: i32, %arg1: i32) -> (i32, i32, i32) {
    %c0_i32 = arith.constant 0 : i32
    %c0_i32_0 = arith.constant 0 : i32
    return %arg0, %c0_i32, %arg1 : i32, i32, i32
  }
}

</mosaic_0001>

<bundles_post_ra>
// kernel: tpu_custom_call.1
= control target key start
LH: loop header
LB: loop body
LE: loop exit
PB: predicated region body
PF: predicated region fallthrough
CT: control target
= control target key end

     0   :  { %6 = vsyncpa [#allocation3], 0  ;;  %s772_s0 = inlined_call_operand.hbm [shape: f32[2,8,256], index: 0, kind: input, shape index: {}]   ;;  %s773_s1 = inlined_call_operand.hbm [shape: f32[2,8,256], index: 1, kind: output, shape index: {}]  }
   0x1   :  { %8 = vsyncpa [#allocation3 + $0x1], 0 }
   0x2   :  { %9 = vsyncpa [#allocation4], 0 }
   0x3   :  { %11 = vsyncpa [#allocation4 + $0x1], 0  ;;  %s596_s6 = smov 0   ;;  %s598_s7 = smov 0  }
   0x4   :  { %s600_s8 = smov 0   ;;  %s602_s9 = smov 0  }
   0x5   :  { %s604_s10 = smov 0   ;;  %s606_s11 = smov 0  }
   0x6 LB: > { %s382_s12 = sadd.s32 4294967295, %s579_s11   ;;  %s383_s13 = sadd.s32 4294967294, %s579_s11   ;;  %s579_s11 = sphi %s606_s11, %s17_s11   ;;  %s575_s10 = sphi %s604_s10, %s789_s10   ;;  %s571_s9 = sphi %s602_s9, %s788_s9   ;;  %s567_s8 = sphi %s600_s8, %s787_s8   ;;  %s563_s7 = sphi %s598_s7, %s786_s7   ;;  %s559_s6 = sphi %s596_s6, %s785_s6  }
   0x7   : > { %s29_s14 = sadd.s32 1, %s575_s10  ;;  %s38_s15 = sadd.s32 1, %s567_s8 }
   0x8   : > { %p31_p0 = scmp.ge.s32.totalorder %s29_s14, 2  ;;  %p45_p1 = scmp.ne.s32.totalorder %s567_s8, %s563_s7 }
   0x9   : > { %p46_p2 = scmp.eq.s32.totalorder %s579_s11, 0  ;;  %p51_p3 = scmp.ne.s32.totalorder %s563_s7, %s559_s6 }
   0xa   : > { %s791_s14 = smov (%p31_p0, %s29_s14), 0  ;;  %p52_p5 = scmp.eq.s32.totalorder %s382_s12, 0 }
   0xb   : > { %p637_p4 = por %p46_p2, %p45_p1  ;;  %s33_s17 = ssub.s32 %s575_s10, %s791_s14 }
   0xc   : > { %p77_p6 = scmp.eq.s32.totalorder %s382_s12, 1  ;;  %p36_p7 = scmp.eq.s32.totalorder %s33_s17, 0 }
   0xd   : > { %p643_p8 = por %p52_p5, %p51_p3  ;;  %p83_p10 = scmp.eq.s32.totalorder %s383_s13, 1 }
   0xe   : > { %p647_p9 = por %p77_p6, %p45_p1  ;;  %p412_p13 = scmp.lt.s32.totalorder %s579_s11, 2 }
   0xf   : > { %s652_s20 = scalar_select %p36_p7, %s567_s8, %s38_s15  }
  0x10   : > { %s777_s19 = scalar_select %p647_p9, 1, 0 }
  0x11   : > { %p654_p11 = por %p83_p10, %p51_p3  ;;  %s103_s22 = sand.u32 1, %s567_s8  }
  0x12   : > { %s386_s23 = sshll.u32 %s103_s22, 4  ;;  %s398_s24 = sshll.u32 %s575_s10, 8 }
  0x13   : > { %s778_s21 = scalar_select %p654_p11, 1, 0 }
  0x14   : > { %s665_s27 = scalar_lea.hbm %s772_s0, %s398_s24  ;;  %s107_s28 = scalar_lea.vmem [#allocation2], %s386_s23 }
  0x15   : > { %s117_s29 = sshll.u32 %s107_s28, 4  ;;  %p671_p0 = pnand %p412_p13, %p637_p4  ;;  %s667_s29 = int_to_ptr.vmem [resolvable:$true] %s117_s29 }
  0x16   : > { %s104_s2 = scalar_lea.sflag [#allocation3], %s103_s22  ;;  %s467_s3 = scalar_lea.hbm %s665_s27, 256 }
  0x17   : > { %p468_p3 = scmp.ne.s32.totalorder %s665_s27, %s467_s3  ;;  %p469_p5 = pneg %p671_p0 }
  0x18   : > { %s472_s12 = scalar_lea.hbm %s772_s0, 512  ;;  %p473_p4 = scmp.lt.u32.totalorder %s665_s27, %s772_s0 }
  0x19   : > { %p470_p6 = pnand %p469_p5, %p468_p3  ;;  %p474_p10 = scmp.lt.u32.totalorder %s472_s12, %s467_s3 }
  0x1a   : > { %p476_p12 = scmp.lt.u32.totalorder %s467_s3, %s665_s27 }
  0x1b   : > { %p471_p7 = pneg %p470_p6  ;;  %p475_p13 = por %p474_p10, %p473_p4 }
  0x1d   : > { %p477_p1 = por %p476_p12, %p475_p13 }
  0x1f   : > { %p478_p2 = pnand %p477_p1, %p471_p7 }
  0x21   : > { %481 = shalt.err (!%p478_p2)
}
  0x22   : > { %s482_s16 = scalar_lea.vmem %s667_s29, 256  ;;  %s581_s17 = smov [#allocation2]  }
  0x23   : > { %p483_p3 = scmp.ne.s32.totalorder %s667_s29, %s482_s16  ;;  %s487_s22 = sshll.u32 %s581_s17, 4  ;;  %s488_s22 = int_to_ptr.vmem [resolvable:$false] %s487_s22 }
  0x24   : > { %s489_s23 = scalar_lea.vmem %s488_s22, 512  ;;  %p490_p9 = scmp.lt.s32.totalorder %s667_s29, %s488_s22 }
  0x25   : > { %p485_p6 = pnand %p483_p3, %p469_p5  ;;  %p491_p4 = scmp.lt.s32.totalorder %s489_s23, %s482_s16 }
  0x27   : > { %p486_p11 = pneg %p485_p6  ;;  %p492_p10 = por %p491_p4, %p490_p9 }
  0x29   : > { %p493_p12 = pnand %p492_p10, %p486_p11 }
  0x2b   : > { %496 = shalt.err (!%p493_p12)
}
  0x2c   : > { %407 = dma.hbm_to_vmem [thread:$0]  (!%p671_p0), %s665_s27, 256, %s667_s29, %s104_s2  }
  0x2d   : > { %p780_p1 = scmp.lt.s32.totalorder %s579_s11, 3  ;;  %p781_p2 = scmp.ge.s32.totalorder %s579_s11, 1 }
  0x2f   : > { %p123_p5 = pnand %p781_p2, %p780_p1 }
  0x30   : > { %s707_s24 = sand.u32 (!%p123_p5), 1, %s563_s7  }
  0x31   : > { %126 = sbr.rel (%p123_p5) target bundleno = 94 (0x5e), region = 24  ;;  %s390_s25 = sshll.u32 (!%p123_p5), %s707_s24, 4 }
  0x32   : > { %s129_s26 = scalar_lea.sflag (!%p123_p5), [#allocation3], %s707_s24  ;;  %s132_s28 = scalar_lea.vmem (!%p123_p5), [#allocation2], %s390_s25 }
  0x38   : > { %550 = dma.done.wait (%p643_p8), %s129_s26, 256  }
  0x39   : > { %552 = vsyncadd (%p643_p8), %s129_s26, 4294967040  ;;  %v165_v0 = vlaneseq  ;;  %v582_v1 = vmov 1983009808   ;;  %v583_v4 = vmov 1934713408   ;;  %v153_v9 = vld [vmem:[%s132_s28] sm:$0xff] }
  0x3a   : > { %v163_v2 = vunpack.c.l.s4 %v582_v1  ;;  %v194_v5 = vunpack.c.l.s4 %v583_v4  ;;  %v154_v10 = vld [vmem:[%s132_s28 + $0x8] sm:$0xff]  ;;  %v584_v13 = vmov 0.0   ;;  %s150_s18 = scalar_lea.vmem [#allocation5], %s390_s25  ;;  %s399_s29 = sshll.u32 %s571_s9, 8 }
  0x3b   : > { %v166_v3 = vshrl.u32 %v165_v0, 7  ;;  %v157_v11 = vcombine.low %v153_v9, %v154_v10  ;;  %v158_v12 = vcombine.high %v153_v9, %v154_v10  ;;  %v392_v14 = vcombine.high %v154_v10, %v584_v13  ;;  %s298_s27 = sshll.u32 %s150_s18, 4  ;;  %s725_s3 = scalar_lea.hbm %s773_s1, %s399_s29  ;;  %s720_s27 = int_to_ptr.vmem [resolvable:$true] %s298_s27 }
  0x3c   : > { %v164_v6 = vunpack.c.0.s8 %v163_v2  ;;  %v195_v7 = vunpack.c.0.s8 %v194_v5  ;;  %s282_s4 = scalar_lea.sflag [#allocation4], %s707_s24  ;;  %s497_s5 = scalar_lea.vmem %s720_s27, 256 }
  0x3d   : > { %v161_v16 = vcombine.high %v157_v11, %v584_v13  ;;  %p498_p8 = scmp.ne.s32.totalorder %s720_s27, %s497_s5  ;;  %p782_p9 = scmp.ne.s32.totalorder %s777_s19, 0 }
  0x3e   : > { %v167_v8 = vsub.s32 %v164_v6, %v166_v3  ;;  %v198_v15 = vsub.s32 %v195_v7, %v166_v3  ;;  %s585_s9 = smov [#allocation5]  }
  0x3f   : > { %p499_p11 = pnand %p498_p8, %p782_p9  ;;  %s501_s12 = sshll.u32 %s585_s9, 4  ;;  %s502_s12 = int_to_ptr.vmem [resolvable:$false] %s501_s12 }
  0x40   : > { %v168_v17 = vrot.slane %v157_v11, %v167_v8  ;;  %v183_v18 = vrot.slane %v158_v12, %v167_v8  ;;  %v190_v19 = vrot.slane %v392_v14, %v167_v8  ;;  %v175_v20 = vrot.slane %v161_v16, %v167_v8  ;;  %s503_s13 = scalar_lea.vmem %s502_s12, 512  ;;  %p504_p7 = scmp.lt.s32.totalorder %s720_s27, %s502_s12 }
  0x41   : > { %p500_p0 = pneg %p499_p11  ;;  %p505_p13 = scmp.lt.s32.totalorder %s503_s13, %s497_s5 }
  0x42   : > { %v191_v21 = vcombine.low %v168_v17, %v183_v18  ;;  %v192_v22 = vcombine.high %v168_v17, %v183_v18  ;;  %v207_v25 = vcombine.low %v175_v20, %v190_v19  ;;  %v208_v26 = vcombine.high %v175_v20, %v190_v19 }
  0x43   : > { %p506_p3 = por %p505_p13, %p504_p7 }
  0x44   : > { %v199_v23 = vrot.slane %v191_v21, %v198_v15  ;;  %v206_v24 = vrot.slane %v192_v22, %v198_v15  ;;  %v215_v27 = vrot.slane %v207_v25, %v198_v15  ;;  %v222_v28 = vrot.slane %v208_v26, %v198_v15 }
  0x45   : > { %p507_p6 = pnand %p506_p3, %p500_p0 }
  0x46   : > { %v223_v29 = vcombine.low %v199_v23, %v215_v27  ;;  %v224_v30 = vcombine.high %v199_v23, %v215_v27  ;;  %v225_v31 = vcombine.low %v206_v24, %v222_v28  ;;  %v226_v32 = vcombine.high %v206_v24, %v222_v28 }
  0x48   : > { %v237_v33 = vrot.slane %v223_v29, %v167_v8  ;;  %v244_v34 = vrot.slane %v224_v30, %v167_v8  ;;  %v251_v35 = vrot.slane %v225_v31, %v167_v8  ;;  %v258_v36 = vrot.slane %v226_v32, %v167_v8 }
  0x4a   : > { %v259_v37 = vcombine.low %v237_v33, %v244_v34  ;;  %v260_v38 = vcombine.low %v251_v35, %v258_v36 }
  0x4c   : > { %v267_v39 = vrot.slane %v259_v37, %v167_v8  ;;  %v274_v40 = vrot.slane %v260_v38, %v167_v8 }
  0x4e   : > { %v275_v41 = vcombine.low %v267_v39, %v274_v40  ;;  %v276_v42 = vcombine.high %v267_v39, %v274_v40 }
  0x50   : > { %279 = vst [vmem:[%s150_s18] sm:$0xff] %v275_v41  ;;  %280 = vst [vmem:[%s150_s18 + $0x8] sm:$0xff] %v276_v42 }
  0x51   : > { %510 = shalt.err (!%p507_p6)
}
  0x52   : > { %s511_s15 = scalar_lea.hbm %s725_s3, 256  ;;  %s515_s22 = scalar_lea.hbm %s773_s1, 512 }
  0x53   : > { %p512_p4 = scmp.ne.s32.totalorder %s725_s3, %s511_s15  ;;  %p516_p1 = scmp.lt.u32.totalorder %s725_s3, %s773_s1 }
  0x54   : > { %p517_p2 = scmp.lt.u32.totalorder %s515_s22, %s511_s15  ;;  %p519_p8 = scmp.lt.u32.totalorder %s511_s15, %s725_s3 }
  0x55   : > { %p513_p10 = pnand %p512_p4, %p782_p9 }
  0x56   : > { %p518_p5 = por %p517_p2, %p516_p1 }
  0x57   : > { %p514_p12 = pneg %p513_p10 }
  0x58   : > { %p520_p11 = por %p519_p8, %p518_p5 }
  0x5a   : > { %p521_p0 = pnand %p520_p11, %p514_p12 }
  0x5c   : > { %524 = shalt.err (!%p521_p0)
}
  0x5d   : > { %402 = dma.vmem_to_hbm [thread:$0]  (%p782_p9), %s720_s27, 256, %s725_s3, %s282_s4  }
  0x5e PF: > { %s310_s25 = sand.u32 1, %s559_s6   ;;  %p783_p7 = scmp.ne.s32.totalorder %s778_s21, 0 }
  0x5f   : > { %p784_p13 = scmp.ge.s32.totalorder %s579_s11, 2  ;;  %s311_s26 = scalar_lea.sflag [#allocation4], %s310_s25 }
  0x61   : > { %p409_p3 = pnand %p784_p13, %p783_p7 }
  0x63   : > { %554 = dma.done.wait (!%p409_p3), %s311_s26, 256  }
  0x64   : > { %556 = vsyncadd (!%p409_p3), %s311_s26, 4294967040  ;;  %s17_s11 = sadd.s32 1, %s579_s11   ;;  %s785_s6 = smov %s563_s7 }
  0x65   : > { %p14_p6 = scmp.ge.s32.totalorder %s17_s11, 4   ;;  %s786_s7 = smov %s567_s8 }
  0x66   : > { %s787_s8 = smov %s652_s20  ;;  %s788_s9 = smov %s575_s10 }
  0x67   : > { %s789_s10 = smov %s791_s14  ;;  %16 = sbr.rel (!%p14_p6) target bundleno = 6 (0x6), region = 69 }
  0x6e   :  { %316 = vsyncpa [#allocation3], 1 }
  0x6f   :  { %318 = vsyncpa [#allocation3 + $0x1], 1 }
  0x70   :  { %319 = vsyncpa [#allocation4], 1 }
  0x71   :  { %321 = vsyncpa [#allocation4 + $0x1], 1 }

</bundles_post_ra>
